<compile_context>
chip_gen: v7x
topology: tpu7x:2x2x1
jax: 0.10.0
libtpu: 0.0.40
codegen_flags: <defaults>
</compile_context>

<pallas_src>
import jax
import jax.numpy as jnp
from jax.experimental import pallas as pl
from jax.experimental.pallas import tpu as pltpu

HIDDEN = 256
TB_MAX = 2048  # batch-tile cap; ~8 MiB of VMEM temporaries, fine on v5e/v6e/v7x


def _round_up(x, m):
    return (x + m - 1) // m * m


def _choose_batch_tile(B):
    """Batch tile: full batch for tiny B; otherwise >=2 tiles (v7x megacore),
    multiple of 8 sublanes, capped at TB_MAX."""
    if B <= 16:
        return B                      # single full-extent tile, no layout padding needed
    return min(TB_MAX, _round_up(pl.cdiv(B, 2), 8))


def critic_kernel(state_ref, action_ref, w1s_ref, w1a_ref, b1_ref,
                  w2_ref, b2_ref, w3_ref, b3_ref, o_ref):
    # Fused concat: [s, a] @ W1 == s @ W1[:S] + a @ W1[S:]
    xs = state_ref[...].astype(jnp.bfloat16)
    xa = action_ref[...].astype(jnp.bfloat16)

    h1 = jnp.dot(xs, w1s_ref[...], preferred_element_type=jnp.float32)
    h1 = h1 + jnp.dot(xa, w1a_ref[...], preferred_element_type=jnp.float32)
    h1 = jnp.maximum(h1 + b1_ref[...], 0.0)            # f32 bias/ReLU

    h2 = jnp.dot(h1.astype(jnp.bfloat16), w2_ref[...],
                 preferred_element_type=jnp.float32)
    h2 = jnp.maximum(h2 + b2_ref[...], 0.0)

    # fc3 (out_features = 1): VPU elementwise mul + XLU lane reduction instead
    # of a 1-column MXU matmul; b3 is a scalar read from SMEM.
    q = jnp.sum(h2 * w3_ref[...], axis=-1, keepdims=True) + b3_ref[0, 0]
    o_ref[...] = q.astype(o_ref.dtype)


def prepare_critic_params(params, state_dim):
    """One-time conversion of PyTorch-layout params into kernel layout.

    Call once per parameter update (not per forward) so the slice/cast XLA ops
    and the ~266 KB f32 weight re-read stay out of the hot RL loop.
    """
    w1, b1, w2, b2, w3, b3 = params
    return dict(
        w1s=w1[:state_dim].astype(jnp.bfloat16),        # (S, 256)
        w1a=w1[state_dim:].astype(jnp.bfloat16),        # (A, 256)
        b1=b1.reshape(1, HIDDEN).astype(jnp.float32),
        w2=w2.astype(jnp.bfloat16),                     # (256, 256)
        b2=b2.reshape(1, HIDDEN).astype(jnp.float32),
        w3=w3.reshape(1, HIDDEN).astype(jnp.float32),   # fc3 as a lane row
        b3=b3.reshape(1, 1).astype(jnp.float32),        # scalar for SMEM
    )


def critic_forward(state, action, prepared):
    """state: [B, state_dim], action: [B, action_dim] -> [B, 1] (float32)."""
    B, S = state.shape
    A = action.shape[1]
    d_in = S + A

    state = state.astype(jnp.float32)
    action = action.astype(jnp.float32)

    TB = _choose_batch_tile(B)
    grid = (pl.cdiv(B, TB),)   # ragged last tile handled by Pallas; no jnp.pad copy

    def pinned(shape):
        return pl.BlockSpec(shape, lambda i: (0, 0))

    in_specs = [
        pl.BlockSpec((TB, S), lambda i: (i, 0)),    # state tile
        pl.BlockSpec((TB, A), lambda i: (i, 0)),    # action tile
        pinned((S, HIDDEN)),                        # w1 (state part), bf16
        pinned((A, HIDDEN)),                        # w1 (action part), bf16
        pinned((1, HIDDEN)),                        # b1, f32
        pinned((HIDDEN, HIDDEN)),                   # w2, bf16
        pinned((1, HIDDEN)),                        # b2, f32
        pinned((1, HIDDEN)),                        # w3 row, f32
        pl.BlockSpec((1, 1), lambda i: (0, 0),      # b3 scalar in SMEM
                     memory_space=pltpu.MemorySpace.SMEM),
    ]
    out_specs = pl.BlockSpec((TB, 1), lambda i: (i, 0))

    flops = 2 * B * (d_in * HIDDEN + HIDDEN * HIDDEN + HIDDEN)
    bytes_accessed = (
        B * d_in * 4 + B * 4                             # activations in / q out
        + (d_in * HIDDEN + HIDDEN * HIDDEN) * 2          # bf16 weights
        + (3 * HIDDEN + 1) * 4                           # biases + w3 row
    )

    return pl.pallas_call(
        critic_kernel,
        out_shape=jax.ShapeDtypeStruct((B, 1), jnp.float32),
        grid=grid,
        in_specs=in_specs,
        out_specs=out_specs,
        compiler_params=pltpu.CompilerParams(
            dimension_semantics=("parallel",),
            vmem_limit_bytes=32 * 1024 * 1024),
        cost_estimate=pl.CostEstimate(
            flops=flops, transcendentals=0, bytes_accessed=bytes_accessed),
    )(state, action, prepared["w1s"], prepared["w1a"], prepared["b1"],
      prepared["w2"], prepared["b2"], prepared["w3"], prepared["b3"])


def init_critic_params(key, state_dim, action_dim, hidden=HIDDEN):
    """Deterministic synthetic init (PyTorch-style uniform fan-in scaling)."""
    d_in = state_dim + action_dim
    ks = jax.random.split(key, 6)

    def uni(k, shape, fan_in):
        bound = 1.0 / jnp.sqrt(fan_in)
        return jax.random.uniform(k, shape, jnp.float32, -bound, bound)

    w1 = uni(ks[0], (d_in, hidden), d_in)
    b1 = uni(ks[1], (1, hidden), d_in)
    w2 = uni(ks[2], (hidden, hidden), hidden)
    b2 = uni(ks[3], (hidden, hidden // hidden), hidden)  # (hidden, 1) -> reshaped below
    b2 = uni(ks[3], (1, hidden), hidden)
    w3 = uni(ks[4], (hidden, 1), hidden)
    b3 = uni(ks[5], (1, 1), hidden)
    return (w1, b1, w2, b2, w3, b3)


def _ref_f32(state, action, params):
    w1, b1, w2, b2, w3, b3 = params
    x = jnp.concatenate([state, action], axis=1)
    h = jnp.maximum(x @ w1 + b1, 0.0)
    h = jnp.maximum(h @ w2 + b2, 0.0)
    return h @ w3 + b3


def _ref_bf16(state, action, params):
    """bf16-matmul / f32-accumulate reference matching the kernel's numerics."""
    w1, b1, w2, b2, w3, b3 = params
    x = jnp.concatenate([state, action], axis=1)
    h = jnp.maximum(
        jnp.dot(x.astype(jnp.bfloat16), w1.astype(jnp.bfloat16),
                preferred_element_type=jnp.float32) + b1, 0.0)
    h = jnp.maximum(
        jnp.dot(h.astype(jnp.bfloat16), w2.astype(jnp.bfloat16),
                preferred_element_type=jnp.float32) + b2, 0.0)
    return jnp.sum(h * w3.reshape(1, -1), axis=-1, keepdims=True) + b3


if __name__ == "__main__":
    key = jax.random.PRNGKey(0)
    k_s, k_a, k_p, k_s2, k_a2 = jax.random.split(key, 5)

    state_dim, action_dim = 12, 4
    params = init_critic_params(k_p, state_dim, action_dim)
    prepared = prepare_critic_params(params, state_dim)   # one-time weight prep

    # --- small batch: single full-extent tile path ---
    batch = 8
    state = jax.random.normal(k_s, (batch, state_dim), jnp.float32)
    action = jax.random.normal(k_a, (batch, action_dim), jnp.float32)

    out = jax.block_until_ready(critic_forward(state, action, prepared))
    assert out.shape == (batch, 1)
    assert jnp.allclose(out, _ref_bf16(state, action, params), atol=5e-3, rtol=5e-3)
    assert jnp.allclose(out, _ref_f32(state, action, params), atol=3e-2, rtol=3e-2)

    # --- larger batch: 2 parallel tiles + ragged last block (no padding copy) ---
    batch2 = 20
    state2 = jax.random.normal(k_s2, (batch2, state_dim), jnp.float32)
    action2 = jax.random.normal(k_a2, (batch2, action_dim), jnp.float32)

    out2 = jax.block_until_ready(critic_forward(state2, action2, prepared))
    assert out2.shape == (batch2, 1)
    assert jnp.allclose(out2, _ref_bf16(state2, action2, params), atol=5e-3, rtol=5e-3)
    assert jnp.allclose(out2, _ref_f32(state2, action2, params), atol=3e-2, rtol=3e-2)

    print("KERNEL_OK")
</pallas_src>

<mosaic_0001>
module attributes {stable_mosaic.version = 11 : i64} {
  func.func @critic_kernel(%arg0: i32, %arg1: memref<8x12xf32, #tpu.memory_space<vmem>>, %arg2: memref<8x4xf32, #tpu.memory_space<vmem>>, %arg3: memref<12x256xbf16, #tpu.memory_space<vmem>>, %arg4: memref<4x256xbf16, #tpu.memory_space<vmem>>, %arg5: memref<1x256xf32, #tpu.memory_space<vmem>>, %arg6: memref<256x256xbf16, #tpu.memory_space<vmem>>, %arg7: memref<1x256xf32, #tpu.memory_space<vmem>>, %arg8: memref<1x256xf32, #tpu.memory_space<vmem>>, %arg9: memref<1x1xf32, #tpu.memory_space<smem>>, %arg10: memref<8x1xf32, #tpu.memory_space<vmem>>) attributes {dimension_semantics = [#tpu.dimension_semantics<parallel>], iteration_bounds = array<i64: 1>, scalar_prefetch = 0 : i64, scratch_operands = 0 : i64, tpu.core_type = #tpu.core_type<tc>, window_params = [{transform_indices = @transform_0, window_bounds = array<i64: 8, 12>}, {transform_indices = @transform_1, window_bounds = array<i64: 8, 4>}, {pipeline_mode = #tpu.pipeline_mode<synchronous>, transform_indices = @transform_2, window_bounds = array<i64: 12, 256>}, {pipeline_mode = #tpu.pipeline_mode<synchronous>, transform_indices = @transform_3, window_bounds = array<i64: 4, 256>}, {pipeline_mode = #tpu.pipeline_mode<synchronous>, transform_indices = @transform_4, window_bounds = array<i64: 1, 256>}, {pipeline_mode = #tpu.pipeline_mode<synchronous>, transform_indices = @transform_5, window_bounds = array<i64: 256, 256>}, {pipeline_mode = #tpu.pipeline_mode<synchronous>, transform_indices = @transform_6, window_bounds = array<i64: 1, 256>}, {pipeline_mode = #tpu.pipeline_mode<synchronous>, transform_indices = @transform_7, window_bounds = array<i64: 1, 256>}, {transform_indices = @transform_8, window_bounds = array<i64: 1, 1>}, {transform_indices = @transform_9, window_bounds = array<i64: 8, 1>}]} {
    %c0 = arith.constant 0 : index
    %c0_0 = arith.constant 0 : index
    %0 = vector.load %arg1[%c0, %c0_0] : memref<8x12xf32, #tpu.memory_space<vmem>>, vector<8x12xf32>
    %1 = arith.truncf %0 : vector<8x12xf32> to vector<8x12xbf16>
    %c0_1 = arith.constant 0 : index
    %c0_2 = arith.constant 0 : index
    %2 = vector.load %arg2[%c0_1, %c0_2] : memref<8x4xf32, #tpu.memory_space<vmem>>, vector<8x4xf32>
    %3 = arith.truncf %2 : vector<8x4xf32> to vector<8x4xbf16>
    %c0_3 = arith.constant 0 : index
    %c0_4 = arith.constant 0 : index
    %4 = vector.load %arg3[%c0_3, %c0_4] : memref<12x256xbf16, #tpu.memory_space<vmem>>, vector<12x256xbf16>
    %cst = arith.constant dense<0.000000e+00> : vector<8x256xf32>
    %5 = tpu.matmul %1, %4, %cst {dimension_numbers = #tpu.dot_dimension_numbers<[1], [0], [0], [1], [0, 0, 1, 1], [], []>} : vector<8x12xbf16>, vector<12x256xbf16>, vector<8x256xf32> -> vector<8x256xf32>
    %c0_5 = arith.constant 0 : index
    %c0_6 = arith.constant 0 : index
    %6 = vector.load %arg4[%c0_5, %c0_6] : memref<4x256xbf16, #tpu.memory_space<vmem>>, vector<4x256xbf16>
    %cst_7 = arith.constant dense<0.000000e+00> : vector<8x256xf32>
    %7 = tpu.matmul %3, %6, %cst_7 {dimension_numbers = #tpu.dot_dimension_numbers<[1], [0], [0], [1], [0, 0, 1, 1], [], []>} : vector<8x4xbf16>, vector<4x256xbf16>, vector<8x256xf32> -> vector<8x256xf32>
    %8 = arith.addf %5, %7 : vector<8x256xf32>
    %c0_8 = arith.constant 0 : index
    %c0_9 = arith.constant 0 : index
    %9 = vector.load %arg5[%c0_8, %c0_9] : memref<1x256xf32, #tpu.memory_space<vmem>>, vector<1x256xf32>
    %10 = vector.broadcast %9 : vector<1x256xf32> to vector<8x256xf32>
    %11 = arith.addf %8, %10 : vector<8x256xf32>
    %cst_10 = arith.constant 0.000000e+00 : f32
    %12 = vector.broadcast %cst_10 : f32 to vector<8x256xf32>
    %13 = arith.maximumf %11, %12 : vector<8x256xf32>
    %14 = arith.truncf %13 : vector<8x256xf32> to vector<8x256xbf16>
    %c0_11 = arith.constant 0 : index
    %c0_12 = arith.constant 0 : index
    %15 = vector.load %arg6[%c0_11, %c0_12] : memref<256x256xbf16, #tpu.memory_space<vmem>>, vector<256x256xbf16>
    %cst_13 = arith.constant dense<0.000000e+00> : vector<8x256xf32>
    %16 = tpu.matmul %14, %15, %cst_13 {dimension_numbers = #tpu.dot_dimension_numbers<[1], [0], [0], [1], [0, 0, 1, 1], [], []>} : vector<8x256xbf16>, vector<256x256xbf16>, vector<8x256xf32> -> vector<8x256xf32>
    %c0_14 = arith.constant 0 : index
    %c0_15 = arith.constant 0 : index
    %17 = vector.load %arg7[%c0_14, %c0_15] : memref<1x256xf32, #tpu.memory_space<vmem>>, vector<1x256xf32>
    %18 = vector.broadcast %17 : vector<1x256xf32> to vector<8x256xf32>
    %19 = arith.addf %16, %18 : vector<8x256xf32>
    %cst_16 = arith.constant 0.000000e+00 : f32
    %20 = vector.broadcast %cst_16 : f32 to vector<8x256xf32>
    %21 = arith.maximumf %19, %20 : vector<8x256xf32>
    %c0_17 = arith.constant 0 : index
    %c0_18 = arith.constant 0 : index
    %22 = vector.load %arg8[%c0_17, %c0_18] : memref<1x256xf32, #tpu.memory_space<vmem>>, vector<1x256xf32>
    %23 = vector.broadcast %22 : vector<1x256xf32> to vector<8x256xf32>
    %24 = arith.mulf %21, %23 : vector<8x256xf32>
    %cst_19 = arith.constant dense<0.000000e+00> : vector<8xf32>
    %25 = vector.multi_reduction <add>, %24, %cst_19 [1] : vector<8x256xf32> to vector<8xf32>
    %26 = vector.shape_cast %25 : vector<8xf32> to vector<8x1xf32>
    %c0_20 = arith.constant 0 : index
    %c0_21 = arith.constant 0 : index
    %27 = memref.load %arg9[%c0_20, %c0_21] : memref<1x1xf32, #tpu.memory_space<smem>>
    %28 = vector.broadcast %27 : f32 to vector<8x1xf32>
    %29 = arith.addf %26, %28 : vector<8x1xf32>
    %c0_22 = arith.constant 0 : index
    %c0_23 = arith.constant 0 : index
    %30 = vector.load %arg10[%c0_22, %c0_23] : memref<8x1xf32, #tpu.memory_space<vmem>>, vector<8x1xf32>
    tpu.vector_store %arg10[%c0_22, %c0_23], %29 {strides = array<i32>} : memref<8x1xf32, #tpu.memory_space<vmem>>, vector<8x1xf32>,
    return
  }
  func.func @transform_0(%arg0: i32) -> (i32, i32) {
    %c0_i32 = arith.constant 0 : i32
    %c0_i32_0 = arith.constant 0 : i32
    return %arg0, %c0_i32 : i32, i32
  }
  func.func @transform_1(%arg0: i32) -> (i32, i32) {
    %c0_i32 = arith.constant 0 : i32
    %c0_i32_0 = arith.constant 0 : i32
    return %arg0, %c0_i32 : i32, i32
  }
  func.func @transform_2(%arg0: i32) -> (i32, i32) {
    %c0_i32 = arith.constant 0 : i32
    %c0_i32_0 = arith.constant 0 : i32
    %c0_i32_1 = arith.constant 0 : i32
    return %c0_i32, %c0_i32_0 : i32, i32
  }
  func.func @transform_3(%arg0: i32) -> (i32, i32) {
    %c0_i32 = arith.constant 0 : i32
    %c0_i32_0 = arith.constant 0 : i32
    %c0_i32_1 = arith.constant 0 : i32
    return %c0_i32, %c0_i32_0 : i32, i32
  }
  func.func @transform_4(%arg0: i32) -> (i32, i32) {
    %c0_i32 = arith.constant 0 : i32
    %c0_i32_0 = arith.constant 0 : i32
    %c0_i32_1 = arith.constant 0 : i32
    return %c0_i32, %c0_i32_0 : i32, i32
  }
  func.func @transform_5(%arg0: i32) -> (i32, i32) {
    %c0_i32 = arith.constant 0 : i32
    %c0_i32_0 = arith.constant 0 : i32
    %c0_i32_1 = arith.constant 0 : i32
    return %c0_i32, %c0_i32_0 : i32, i32
  }
  func.func @transform_6(%arg0: i32) -> (i32, i32) {
    %c0_i32 = arith.constant 0 : i32
    %c0_i32_0 = arith.constant 0 : i32
    %c0_i32_1 = arith.constant 0 : i32
    return %c0_i32, %c0_i32_0 : i32, i32
  }
  func.func @transform_7(%arg0: i32) -> (i32, i32) {
    %c0_i32 = arith.constant 0 : i32
    %c0_i32_0 = arith.constant 0 : i32
    %c0_i32_1 = arith.constant 0 : i32
    return %c0_i32, %c0_i32_0 : i32, i32
  }
  func.func @transform_8(%arg0: i32) -> (i32, i32) {
    %c0_i32 = arith.constant 0 : i32
    %c0_i32_0 = arith.constant 0 : i32
    %c0_i32_1 = arith.constant 0 : i32
    return %c0_i32, %c0_i32_0 : i32, i32
  }
  func.func @transform_9(%arg0: i32) -> (i32, i32) {
    %c0_i32 = arith.constant 0 : i32
    %c0_i32_0 = arith.constant 0 : i32
    return %arg0, %c0_i32 : i32, i32
  }
}

</mosaic_0001>

<bundles_post_ra>
// kernel: tpu_custom_call.1
= control target key start
LH: loop header
LB: loop body
LE: loop exit
PB: predicated region body
PF: predicated region fallthrough
CT: control target
= control target key end

     0   :  { %15 = vsyncpa [#allocation4], 0  ;;  %s737_s0 = inlined_call_operand.hbm [shape: f32[8,12], index: 0, kind: input, shape index: {}]   ;;  %s738_s1 = inlined_call_operand.vmem [shape: f32[8,4], index: 1, kind: input, shape index: {}]   ;;  %s739_s2 = inlined_call_operand.vmem [shape: bf16[12,256], index: 2, kind: input, shape index: {}]   ;;  %s740_s3 = inlined_call_operand.vmem [shape: bf16[4,256], index: 3, kind: input, shape index: {}]   ;;  %s741_s4 = inlined_call_operand.vmem [shape: f32[1,256], index: 4, kind: input, shape index: {}]   ;;  %s742_s5 = inlined_call_operand.hbm [shape: bf16[256,256], index: 5, kind: input, shape index: {}]   ;;  %s743_s6 = inlined_call_operand.vmem [shape: f32[1,256], index: 6, kind: input, shape index: {}]   ;;  %s744_s7 = inlined_call_operand.vmem [shape: f32[1,256], index: 7, kind: input, shape index: {}]   ;;  %s745_s8 = inlined_call_operand.<no memory space> [shape: f32[1,1], index: 8, kind: input, shape index: {}]   ;;  %s746_s9 = inlined_call_operand.vmem [shape: f32[8,1], index: 9, kind: output, shape index: {}]  }
   0x1   :  { %16 = vsyncpa [#allocation6], 0  ;;  %s624_s30 = smov [#allocation3]   ;;  %s625_s11 = smov [#allocation5]  }
   0x2   :  { %s23_s10 = sshll.u32 %s624_s30, 4  ;;  %s40_s12 = sshll.u32 %s625_s11, 4  ;;  %s24_s10 = int_to_ptr.vmem [resolvable:$true] %s23_s10  ;;  %s679_s12 = int_to_ptr.vmem [resolvable:$true] %s40_s12 }
   0x3   :  { %s576_s15 = scalar_lea.hbm %s737_s0, 128 }
   0x4   :  { %p577_p0 = scmp.ne.s32.totalorder %s737_s0, %s576_s15  ;;  %p580_p1 = scmp.lt.u32.totalorder %s576_s15, %s737_s0 }
   0x6   :  { %p582_p2 = pnand %p580_p1, %p577_p0 }
   0x8   :  { %585 = shalt.err (!%p582_p2)
}
   0x9   :  { %s586_s20 = scalar_lea.vmem %s24_s10, 128  ;;  %p591_p4 = scmp.lt.s32.totalorder %s24_s10, %s24_s10 }
   0xa   :  { %p587_p3 = scmp.ne.s32.totalorder %s24_s10, %s586_s20  ;;  %p592_p5 = scmp.lt.s32.totalorder %s586_s20, %s586_s20 }
   0xc   :  { %p593_p6 = por %p592_p5, %p591_p4 }
   0xe   :  { %p594_p7 = pnand %p593_p6, %p587_p3 }
  0x10   :  { %597 = shalt.err (!%p594_p7)
}
  0x11   :  { %26 = dma.hbm_to_vmem [thread:$0]  %s737_s0, 128, %s24_s10, [#allocation4]  }
  0x12   :  { %s598_s25 = scalar_lea.hbm %s742_s5, 4096 }
  0x13   :  { %p599_p8 = scmp.ne.s32.totalorder %s742_s5, %s598_s25  ;;  %p602_p9 = scmp.lt.u32.totalorder %s598_s25, %s742_s5 }
  0x15   :  { %p604_p10 = pnand %p602_p9, %p599_p8 }
  0x17   :  { %607 = shalt.err (!%p604_p10)
}
  0x18   :  { %s608_s30 = scalar_lea.vmem %s679_s12, 4096  ;;  %p613_p12 = scmp.lt.s32.totalorder %s679_s12, %s679_s12 }
  0x19   :  { %p609_p11 = scmp.ne.s32.totalorder %s679_s12, %s608_s30  ;;  %p614_p13 = scmp.lt.s32.totalorder %s608_s30, %s608_s30 }
  0x1b   :  { %p615_p0 = por %p614_p13, %p613_p12 }
  0x1d   :  { %p616_p1 = pnand %p615_p0, %p609_p11 }
  0x1f   :  { %619 = shalt.err (!%p616_p1)
}
  0x20   :  { %s626_s0 = smov 128   ;;  %s627_s10 = smov 8  }
  0x21   :  { %46 = dma.hbm_to_vmem [thread:$0]  %s742_s5, 4096, %s679_s12, [#allocation6], %s626_s0, %s626_s0, %s627_s10  }
  0x22   :  { %620 = dma.done.wait [#allocation4], 128  }
  0x23   :  { %621 = vsyncadd [#allocation4], 4294967168 }
  0x24   :  { %622 = dma.done.wait [#allocation6], 4096  }
  0x25   :  { %623 = vsyncadd [#allocation6], 4294963200  ;;  %v628_v0 = vmov 0   ;;  %vm80_vm0 = vcmask 1041408   ;;  %v62_v2 = vld [vmem:[%s738_s1] sm:$0xff]  ;;  %vm140_vm1 = vcmask 1045504   ;;  %v190_v43 = vlaneseq }
  0x26   :  { %119 = vmatprep.mubr.bf16.mxu1 %v628_v0  ;;  %v481_v1 = vld.sshfl [vmem:[%s740_s3] sm:$0x33 pattern:$0x76325410]  ;;  %v63_v7 = vpack.c.bf16 %v62_v2, %v62_v2  ;;  %v528_v8 = vld [vmem:[#allocation5 + $0x4] ss:$8 sps:$4 sm:$0xff]  }
  0x27   :  { %v75_v3 = vcombine.high %v481_v1, %v481_v1  ;;  %v82_v4 = vsel %vm80_vm0, %v481_v1, 0  ;;  %v525_v5 = vld [vmem:[%s739_s2 + $0x4] ss:$8 sps:$4 sm:$0x3f]   ;;  %v530_v9 = vld [vmem:[#allocation5] ss:$8 sps:$4 sm:$0xff]   ;;  %410 = vmatprep.subr.bf16.mxu0 %v528_v8 }
  0x28   :  { %v527_v6 = vld [vmem:[%s739_s2] ss:$8 sps:$4 sm:$0x3f]   ;;  %vm76_vm2 = vcmask 31744   ;;  %v531_v10 = vld [vmem:[#allocation5 + $0x14] ss:$8 sps:$4 sm:$0xff]   ;;  %411 = vmatpush1.bf16.msra.mxu0 %v530_v9 }
  0x29   :  { %482 = vmatprep.subr.msk.bf16.mxu1 %vm80_vm0, %v75_v3  ;;  %v142_v11 = vsel %vm140_vm1, %v527_v6, 0  ;;  %v533_v12 = vld [vmem:[#allocation5 + $0x10] ss:$8 sps:$4 sm:$0xff]   ;;  %412 = vmatprep.subr.bf16.mxu0 %v531_v10  ;;  %v534_v13 = vld [vmem:[#allocation5 + $0x24] ss:$8 sps:$4 sm:$0xff]   ;;  %vm136_vm3 = vcmask 97280  }
  0x2a   :  { %88 = vmatpush1.bf16.msra.mxu1 %v82_v4  ;;  %v60_v14 = vld [vmem:[#allocation3] sm:$0xff]  ;;  %v536_v15 = vld [vmem:[#allocation5 + $0x20] ss:$8 sps:$4 sm:$0xff]   ;;  %v540_v19 = vld [vmem:[#allocation5 + $0x44] ss:$8 sps:$4 sm:$0xff]   ;;  %v191_v44 = vshrl.u32 %v190_v43, 7 }
  0x2b   :  { %486 = vmatprep.subr.msk.bf16.mxu1 %vm140_vm1, %v525_v5  ;;  %v61_v16 = vpack.c.bf16 %v60_v14, %v60_v14  ;;  %v537_v17 = vld [vmem:[#allocation5 + $0x34] ss:$8 sps:$4 sm:$0xff]   ;;  %v539_v18 = vld [vmem:[#allocation5 + $0x30] ss:$8 sps:$4 sm:$0xff]   ;;  %v542_v20 = vld [vmem:[#allocation5 + $0x40] ss:$8 sps:$4 sm:$0xff]  }
  0x2c   :  { %413 = vmatpush1.bf16.msra.mxu0 %v533_v12  ;;  %v543_v21 = vld [vmem:[#allocation5 + $0x54] ss:$8 sps:$4 sm:$0xff]   ;;  %v545_v22 = vld [vmem:[#allocation5 + $0x50] ss:$8 sps:$4 sm:$0xff]   ;;  %v546_v23 = vld [vmem:[#allocation5 + $0x64] ss:$8 sps:$4 sm:$0xff]  }
  0x2d   :  { %483 = vmatmul.mubr.msk.bf16.vlgmr.msra.gmra.mrb[0].mxu1 %vm76_vm2, %v63_v7  ;;  %414 = vmatprep.subr.bf16.mxu0 %v534_v13  ;;  %v548_v24 = vld [vmem:[#allocation5 + $0x60] ss:$8 sps:$4 sm:$0xff]   ;;  %v549_v25 = vld [vmem:[#allocation5 + $0x74] ss:$8 sps:$4 sm:$0xff]   ;;  %v551_v26 = vld [vmem:[#allocation5 + $0x70] ss:$8 sps:$4 sm:$0xff]  }
  0x2e   :  { %148 = vmatpush1.bf16.msra.mxu1 %v142_v11  ;;  %179 = vmatprep.mubr.bf16.mxu1 %v628_v0  ;;  %v552_v27 = vld [vmem:[#allocation5 + $0x84] ss:$8 sps:$4 sm:$0xff]   ;;  %v554_v28 = vld [vmem:[#allocation5 + $0x80] ss:$8 sps:$4 sm:$0xff]   ;;  %v555_v29 = vld [vmem:[#allocation5 + $0x94] ss:$8 sps:$4 sm:$0xff]  }
  0x2f   :  { %v557_v30 = vld [vmem:[#allocation5 + $0x90] ss:$8 sps:$4 sm:$0xff]   ;;  %v558_v31 = vld [vmem:[#allocation5 + $0xa4] ss:$8 sps:$4 sm:$0xff]   ;;  %v560_v32 = vld [vmem:[#allocation5 + $0xa0] ss:$8 sps:$4 sm:$0xff]  }
  0x30   :  { %415 = vmatpush1.bf16.msra.mxu0 %v536_v15  ;;  %v561_v33 = vld [vmem:[#allocation5 + $0xb4] ss:$8 sps:$4 sm:$0xff]   ;;  %v563_v34 = vld [vmem:[#allocation5 + $0xb0] ss:$8 sps:$4 sm:$0xff]   ;;  %v564_v35 = vld [vmem:[#allocation5 + $0xc4] ss:$8 sps:$4 sm:$0xff]  }
  0x31   :  { %416 = vmatprep.subr.bf16.mxu0 %v537_v17  ;;  %v566_v36 = vld [vmem:[#allocation5 + $0xc0] ss:$8 sps:$4 sm:$0xff]   ;;  %v567_v37 = vld [vmem:[#allocation5 + $0xd4] ss:$8 sps:$4 sm:$0xff]   ;;  %v569_v38 = vld [vmem:[#allocation5 + $0xd0] ss:$8 sps:$4 sm:$0xff]  }
  0x32   :  { %v570_v39 = vld [vmem:[#allocation5 + $0xe4] ss:$8 sps:$4 sm:$0xff]   ;;  %v572_v40 = vld [vmem:[#allocation5 + $0xe0] ss:$8 sps:$4 sm:$0xff]   ;;  %v573_v41 = vld [vmem:[#allocation5 + $0xf4] ss:$8 sps:$4 sm:$0xff]  }
  0x33   :  { %v575_v42 = vld [vmem:[#allocation5 + $0xf0] ss:$8 sps:$4 sm:$0xff]   ;;  %v192_v49 = vsub.s32 0, %v191_v44  ;;  %v196_v51 = vsub.s32 1, %v191_v44  ;;  %vm473_vm4 = vcmask 7168  }
  0x34   :  { %417 = vmatpush1.bf16.msra.mxu0 %v539_v18  ;;  %v188_v50 = vld [vmem:[%s741_s4] sm:$0x3] }
  0x35   :  { %487 = vmatmul.mubr.msk.bf16.vlgmr.msra.gmra.mrb[4].mxu1 %vm136_vm3, %v61_v16  ;;  %418 = vmatprep.subr.bf16.mxu0 %v540_v19  ;;  %v193_v52 = vrot.slane %v188_v50, %v192_v49  ;;  %v197_v54 = vrot.slane %v188_v50, %v196_v51  ;;  %v238_v2 = vld [vmem:[%s743_s6] sm:$0x3]  ;;  %v471_v19 = vstv %s745_s8 }
  0x36   :  { %v243_v3 = vrot.slane %v238_v2, %v192_v49  ;;  %v247_v4 = vrot.slane %v238_v2, %v196_v51  ;;  %v453_v5 = vld [vmem:[%s744_s7] sm:$0x3] }
  0x37   :  { %v458_v9 = vrot.slane %v453_v5, %v192_v49  ;;  %v462_v12 = vrot.slane %v453_v5, %v196_v51 }
  0x38   :  { %419 = vmatpush1.bf16.msra.mxu0 %v542_v20 }
  0x39   :  { %420 = vmatprep.subr.bf16.mxu0 %v543_v21 }
  0x3c   :  { %421 = vmatpush1.bf16.msra.mxu0 %v545_v22 }
  0x3d   :  { %422 = vmatprep.subr.bf16.mxu0 %v546_v23 }
  0x40   :  { %423 = vmatpush1.bf16.msra.mxu0 %v548_v24 }
  0x41   :  { %424 = vmatprep.subr.bf16.mxu0 %v549_v25 }
  0x44   :  { %425 = vmatpush1.bf16.msra.mxu0 %v551_v26 }
  0x45   :  { %426 = vmatprep.subr.bf16.mxu0 %v552_v27 }
  0x48   :  { %427 = vmatpush1.bf16.msra.mxu0 %v554_v28 }
  0x49   :  { %428 = vmatprep.subr.bf16.mxu0 %v555_v29 }
  0x4c   :  { %429 = vmatpush1.bf16.msra.mxu0 %v557_v30 }
  0x4d   :  { %430 = vmatprep.subr.bf16.mxu0 %v558_v31 }
  0x50   :  { %431 = vmatpush1.bf16.msra.mxu0 %v560_v32 }
  0x51   :  { %432 = vmatprep.subr.bf16.mxu0 %v561_v33 }
  0x54   :  { %433 = vmatpush1.bf16.msra.mxu0 %v563_v34 }
  0x55   :  { %434 = vmatprep.subr.bf16.mxu0 %v564_v35 }
  0x58   :  { %435 = vmatpush1.bf16.msra.mxu0 %v566_v36 }
  0x59   :  { %436 = vmatprep.subr.bf16.mxu0 %v567_v37 }
  0x5c   :  { %437 = vmatpush1.bf16.msra.mxu0 %v569_v38 }
  0x5d   :  { %438 = vmatprep.subr.bf16.mxu0 %v570_v39 }
  0x60   :  { %439 = vmatpush1.bf16.msra.mxu0 %v572_v40 }
  0x61   :  { %440 = vmatprep.subr.bf16.mxu0 %v573_v41 }
  0x64   :  { %441 = vmatpush1.bf16.msra.mxu0 %v575_v42 }
 0x100   :  { %v121_v45 = vpop.f32.mrb[0].mxu1 }
 0x101   :  { %v123_v46 = vpop.f32.mrb[1].mxu1 }
 0x102   :  { %v125_v47 = vpop.f32.mrb[2].mxu1 }
 0x103   :  { %v126_v48 = vpop.f32.mrb[3].mxu1 }
 0x108   :  { %v181_v53 = vpop.f32.mrb[4].mxu1 }
 0x109   :  { %v182_v55 = vadd.f32 %v181_v53, %v121_v45  ;;  %v183_v56 = vpop.f32.mrb[5].mxu1 }
 0x10a   :  { %v184_v57 = vadd.f32 %v183_v56, %v123_v46  ;;  %v185_v58 = vpop.f32.mrb[6].mxu1 }
 0x10b   :  { %v200_v59 = vadd.f32 %v193_v52, %v182_v55  ;;  %v186_v60 = vpop.f32.mrb[7].mxu1 }
 0x10c   :  { %v201_v61 = vadd.f32 %v197_v54, %v184_v57 }
 0x10d   :  { %v202_v62 = vmax.f32 %v200_v59, 0.0 }
 0x10e   :  { %v203_v63 = vmax.f32 %v201_v61, 0.0 }
 0x10f   :  { %v204_v1 = vpack.c.bf16 %v202_v62, %v202_v62 }
 0x110   :  { %v205_v0 = vpack.c.bf16 %v203_v63, %v203_v63 }
 0x112   :  { %442 = vmatprep.mubr.bf16.mxu0 %v205_v0 }
 0x113   :  { %443 = vmatmul.mubr.bf16.vlgmr.msra.gmra.mrb[0].mxu0 %v204_v1 }
 0x1e6   :  { %v444_v6 = vpop.f32.mrb[0].mxu0 }
 0x1e7   :  { %v445_v7 = vadd.f32 %v444_v6, %v243_v3  ;;  %v446_v8 = vpop.f32.mrb[1].mxu0 }
 0x1e8   :  { %v447_v10 = vadd.f32 %v446_v8, %v247_v4  ;;  %v448_v11 = vpop.f32.mrb[2].mxu0 }
 0x1e9   :  { %v451_v13 = vmax.f32 %v445_v7, 0.0  ;;  %v449_v14 = vpop.f32.mrb[3].mxu0 }
 0x1ea   :  { %v452_v15 = vmax.f32 %v447_v10, 0.0 }
 0x1eb   :  { %v465_v16 = vmul.f32 %v458_v9, %v451_v13 }
 0x1ec   :  { %v466_v17 = vmul.f32 %v462_v12, %v452_v15 }
 0x1ee   :  { %v467_v18 = vadd.f32 %v466_v17, %v465_v16 }
 0x1f0   :  { %468 = vadd.xlane.f32.xlu0 %v467_v18 }
 0x27d   :  { %v469_v20 = vpop.xlane.xlu0 %468 }
 0x27e   :  { %v472_v21 = vadd.f32 %v471_v19, %v469_v20 }
 0x280   :  { %474 = vst.msk [vmem:[%s746_s9] sm:$0xff] %vm473_vm4, %v472_v21 }
 0x281   :  { %479 = vsyncpa [#allocation4], 1 }
 0x282   :  { %480 = vsyncpa [#allocation6], 1 }

</bundles_post_ra>
